<compile_context>
chip_gen: v7x
topology: tpu7x:2x2x1
jax: 0.10.0
libtpu: 0.0.40
codegen_flags: <defaults>
</compile_context>

<pallas_src>
import jax
import jax.numpy as jnp
from jax import lax
from jax.experimental import pallas as pl
from jax.experimental.pallas import tpu as pltpu

EPS = 1e-05
_LANES = 128


def _make_kernel(ts, s_total, need_mask):
    n_groups = ts // _LANES

    def kernel(o_ref, t_ref, acc_ref):
        k = pl.program_id(1)  # reduction (S) axis, innermost / "arbitrary"

        @pl.when(k == 0)
        def _():
            acc_ref[...] = jnp.zeros_like(acc_ref)

        # Load the running per-lane partials once per step (register resident).
        sq_acc = acc_ref[0]   # sum of squared error
        num_acc = acc_ref[1]  # sum of (o<0.5)&(t<0.5)
        d1_acc = acc_ref[2]   # sum of (o<0.5)
        d2_acc = acc_ref[3]   # sum of (t<0.5)

        base = k * ts

        # Stream the (tg, ts) tile in 128-lane slabs.  Everything here is
        # lane-wise VALU work: no XLU reductions, no per-step narrow stores.
        for c in range(n_groups):
            sl = slice(c * _LANES, (c + 1) * _LANES)
            o = o_ref[:, sl].astype(jnp.float32)
            t = t_ref[:, sl].astype(jnp.float32)

            diff = o - t
            ob = o < 0.5
            tb = t < 0.5
            if need_mask:
                # Zero the contribution of columns past the true S (tail of
                # the last, partially out-of-bounds, block).
                col = lax.broadcasted_iota(jnp.int32, o.shape, 1) + (
                    base + c * _LANES)
                valid = col < s_total
                diff = jnp.where(valid, diff, 0.0)
                ob = jnp.logical_and(ob, valid)
                tb = jnp.logical_and(tb, valid)

            sq_acc = sq_acc + diff * diff
            num_acc = num_acc + jnp.logical_and(ob, tb).astype(jnp.float32)
            d1_acc = d1_acc + ob.astype(jnp.float32)
            d2_acc = d2_acc + tb.astype(jnp.float32)

        acc_ref[0] = sq_acc
        acc_ref[1] = num_acc
        acc_ref[2] = d1_acc
        acc_ref[3] = d2_acc

    return kernel


def dice_plus_mse_loss(output, target, lambda_1=0.2, *, ts=None):
    assert output.shape == target.shape and output.ndim == 5
    N, C, D, H, W = output.shape
    G = N * C
    S = D * H * W
    total_elems = output.size

    # Stream in the native dtype; widen to f32 in-register inside the kernel.
    o2 = output.reshape(G, S)
    t2 = target.reshape(G, S)
    itemsize = max(jnp.dtype(o2.dtype).itemsize, jnp.dtype(t2.dtype).itemsize)

    s_ceil = pl.cdiv(S, _LANES) * _LANES
    if ts is None:
        # 2 inputs x 2 pipeline buffers x G x ts x itemsize <= ~12 MiB, so the
        # tile fits the scoped VMEM budget on v5e/v6e/v7x with headroom.
        budget = 12 * 1024 * 1024
        ts = budget // (4 * G * itemsize)
        ts = min(4096, ts)
    ts = min(ts, s_ceil)
    ts = max(_LANES, (ts // _LANES) * _LANES)

    need_mask = (S % ts) != 0
    n_k = pl.cdiv(S, ts)

    # Optional row split so v7x's two TensorCores share the work; keep the
    # tile a multiple of 16 rows so sub-32-bit dtypes stay layout-legal.
    if G >= 32 and G % 32 == 0:
        tg = G // 2
    else:
        tg = G
    n_g = pl.cdiv(G, tg)

    kernel = _make_kernel(ts, S, need_mask)

    parts = pl.pallas_call(
        kernel,
        out_shape=jax.ShapeDtypeStruct((4, G, _LANES), jnp.float32),
        grid_spec=pltpu.PrefetchScalarGridSpec(
            num_scalar_prefetch=0,
            grid=(n_g, n_k),
            in_specs=[
                pl.BlockSpec((tg, ts), lambda i, k: (i, k)),
                pl.BlockSpec((tg, ts), lambda i, k: (i, k)),
            ],
            # Same block across k -> VMEM-resident accumulator, written back
            # to HBM once per G tile (lane-dense 128-wide store).
            out_specs=pl.BlockSpec((4, tg, _LANES), lambda i, k: (0, i, 0)),
        ),
        compiler_params=pltpu.CompilerParams(
            dimension_semantics=("parallel", "arbitrary"),
            vmem_limit_bytes=32 * 1024 * 1024,
        ),
    )(o2, t2)

    # Tiny finalization in plain JAX: fold the 128 per-lane partials and apply
    # the exact PyTorch semantics.
    sums = jnp.sum(parts, axis=-1)            # (4, G)
    sq, num, d1, d2 = sums[0], sums[1], sums[2], sums[3]

    mse = jnp.sum(sq) / total_elems           # MSELoss(reduction='mean')
    dice = 2.0 * num / (d1 + d2 + EPS)        # per (n, c) dice on thresholded maps
    dice_loss = jnp.mean(1.0 - dice)          # DiceLoss().mean()
    return mse * abs(1.0 - lambda_1) + lambda_1 * dice_loss


def _reference(output, target, lambda_1=0.2):
    mse = jnp.mean((output - target) ** 2)
    o = (output < 0.5).astype(jnp.float32)
    t = (target < 0.5).astype(jnp.float32)
    num = jnp.sum(o * t, axis=(2, 3, 4), keepdims=True)
    den1 = jnp.sum(o * o, axis=(2, 3, 4), keepdims=True)
    den2 = jnp.sum(t * t, axis=(2, 3, 4), keepdims=True)
    dice = 2.0 * num / (den1 + den2 + EPS)
    dice_loss = jnp.mean(1.0 - dice)
    return mse * abs(1.0 - lambda_1) + lambda_1 * dice_loss


if __name__ == "__main__":
    key = jax.random.PRNGKey(0)
    k1, k2 = jax.random.split(key)
    shape = (2, 4, 4, 8, 16)  # (N, C, D, H, W)
    output = jax.random.uniform(k1, shape, dtype=jnp.float32)
    target = jax.random.uniform(k2, shape, dtype=jnp.float32)

    loss = dice_plus_mse_loss(output, target)
    loss = jax.block_until_ready(loss)

    ref = jax.block_until_ready(_reference(output, target))
    assert jnp.allclose(loss, ref, rtol=1e-5, atol=1e-6), (loss, ref)

    # Also exercise the ragged-tail (in-kernel mask) path with a non-128 S.
    shape2 = (2, 3, 3, 5, 7)
    o2 = jax.random.uniform(k1, shape2, dtype=jnp.float32)
    t2 = jax.random.uniform(k2, shape2, dtype=jnp.float32)
    loss2 = jax.block_until_ready(dice_plus_mse_loss(o2, t2))
    ref2 = jax.block_until_ready(_reference(o2, t2))
    assert jnp.allclose(loss2, ref2, rtol=1e-5, atol=1e-6), (loss2, ref2)

    print("KERNEL_OK")
</pallas_src>

<mosaic_0001>
module attributes {stable_mosaic.version = 11 : i64} {
  func.func @kernel(%arg0: i32, %arg1: i32, %arg2: memref<8x512xf32, #tpu.memory_space<vmem>>, %arg3: memref<8x512xf32, #tpu.memory_space<vmem>>, %arg4: memref<4x8x128xf32, #tpu.memory_space<vmem>>) attributes {dimension_semantics = [#tpu.dimension_semantics<parallel>, #tpu.dimension_semantics<arbitrary>], iteration_bounds = array<i64: 1, 1>, scalar_prefetch = 0 : i64, scratch_operands = 0 : i64, tpu.core_type = #tpu.core_type<tc>, window_params = [{transform_indices = @transform_0, window_bounds = array<i64: 8, 512>}, {transform_indices = @transform_1, window_bounds = array<i64: 8, 512>}, {transform_indices = @transform_2, window_bounds = array<i64: 4, 8, 128>}]} {
    %c0_i32 = arith.constant 0 : i32
    %0 = arith.cmpi eq, %arg1, %c0_i32 : i32
    %1 = arith.extui %0 : i1 to i32
    %c0_i32_0 = arith.constant 0 : i32
    %2 = arith.cmpi ne, %1, %c0_i32_0 : i32
    scf.if %2 {
      %cst_41 = arith.constant 0.000000e+00 : f32
      %99 = vector.broadcast %cst_41 : f32 to vector<4x8x128xf32>
      %c0_42 = arith.constant 0 : index
      %c0_43 = arith.constant 0 : index
      %c0_44 = arith.constant 0 : index
      %100 = vector.load %arg4[%c0_42, %c0_43, %c0_44] : memref<4x8x128xf32, #tpu.memory_space<vmem>>, vector<4x8x128xf32>
      tpu.vector_store %arg4[%c0_42, %c0_43, %c0_44], %99 {strides = array<i32>} : memref<4x8x128xf32, #tpu.memory_space<vmem>>, vector<4x8x128xf32>,
    } else {
    }
    %c0 = arith.constant 0 : index
    %c0_1 = arith.constant 0 : index
    %c0_2 = arith.constant 0 : index
    %3 = vector.load %arg4[%c0, %c0_1, %c0_2] : memref<4x8x128xf32, #tpu.memory_space<vmem>>, vector<1x8x128xf32>
    %4 = vector.shape_cast %3 : vector<1x8x128xf32> to vector<8x128xf32>
    %c1 = arith.constant 1 : index
    %c0_3 = arith.constant 0 : index
    %c0_4 = arith.constant 0 : index
    %5 = vector.load %arg4[%c1, %c0_3, %c0_4] : memref<4x8x128xf32, #tpu.memory_space<vmem>>, vector<1x8x128xf32>
    %6 = vector.shape_cast %5 : vector<1x8x128xf32> to vector<8x128xf32>
    %c2 = arith.constant 2 : index
    %c0_5 = arith.constant 0 : index
    %c0_6 = arith.constant 0 : index
    %7 = vector.load %arg4[%c2, %c0_5, %c0_6] : memref<4x8x128xf32, #tpu.memory_space<vmem>>, vector<1x8x128xf32>
    %8 = vector.shape_cast %7 : vector<1x8x128xf32> to vector<8x128xf32>
    %c3 = arith.constant 3 : index
    %c0_7 = arith.constant 0 : index
    %c0_8 = arith.constant 0 : index
    %9 = vector.load %arg4[%c3, %c0_7, %c0_8] : memref<4x8x128xf32, #tpu.memory_space<vmem>>, vector<1x8x128xf32>
    %10 = vector.shape_cast %9 : vector<1x8x128xf32> to vector<8x128xf32>
    %c0_9 = arith.constant 0 : index
    %c0_10 = arith.constant 0 : index
    %11 = vector.load %arg2[%c0_9, %c0_10] : memref<8x512xf32, #tpu.memory_space<vmem>>, vector<8x128xf32>
    %c0_11 = arith.constant 0 : index
    %c0_12 = arith.constant 0 : index
    %12 = vector.load %arg3[%c0_11, %c0_12] : memref<8x512xf32, #tpu.memory_space<vmem>>, vector<8x128xf32>
    %13 = arith.subf %11, %12 : vector<8x128xf32>
    %cst = arith.constant 5.000000e-01 : f32
    %14 = vector.broadcast %cst : f32 to vector<8x128xf32>
    %15 = arith.cmpf olt, %11, %14 : vector<8x128xf32>
    %cst_13 = arith.constant 5.000000e-01 : f32
    %16 = vector.broadcast %cst_13 : f32 to vector<8x128xf32>
    %17 = arith.cmpf olt, %12, %16 : vector<8x128xf32>
    %18 = arith.mulf %13, %13 : vector<8x128xf32>
    %19 = arith.addf %4, %18 : vector<8x128xf32>
    %20 = arith.andi %15, %17 : vector<8x128xi1>
    %21 = arith.extui %20 : vector<8x128xi1> to vector<8x128xi32>
    %22 = arith.sitofp %21 : vector<8x128xi32> to vector<8x128xf32>
    %23 = arith.addf %6, %22 : vector<8x128xf32>
    %24 = arith.extui %15 : vector<8x128xi1> to vector<8x128xi32>
    %25 = arith.sitofp %24 : vector<8x128xi32> to vector<8x128xf32>
    %26 = arith.addf %8, %25 : vector<8x128xf32>
    %27 = arith.extui %17 : vector<8x128xi1> to vector<8x128xi32>
    %28 = arith.sitofp %27 : vector<8x128xi32> to vector<8x128xf32>
    %29 = arith.addf %10, %28 : vector<8x128xf32>
    %c0_14 = arith.constant 0 : index
    %c128 = arith.constant 128 : index
    %30 = vector.load %arg2[%c0_14, %c128] : memref<8x512xf32, #tpu.memory_space<vmem>>, vector<8x128xf32>
    %c0_15 = arith.constant 0 : index
    %c128_16 = arith.constant 128 : index
    %31 = vector.load %arg3[%c0_15, %c128_16] : memref<8x512xf32, #tpu.memory_space<vmem>>, vector<8x128xf32>
    %32 = arith.subf %30, %31 : vector<8x128xf32>
    %cst_17 = arith.constant 5.000000e-01 : f32
    %33 = vector.broadcast %cst_17 : f32 to vector<8x128xf32>
    %34 = arith.cmpf olt, %30, %33 : vector<8x128xf32>
    %cst_18 = arith.constant 5.000000e-01 : f32
    %35 = vector.broadcast %cst_18 : f32 to vector<8x128xf32>
    %36 = arith.cmpf olt, %31, %35 : vector<8x128xf32>
    %37 = arith.mulf %32, %32 : vector<8x128xf32>
    %38 = arith.addf %19, %37 : vector<8x128xf32>
    %39 = arith.andi %34, %36 : vector<8x128xi1>
    %40 = arith.extui %39 : vector<8x128xi1> to vector<8x128xi32>
    %41 = arith.sitofp %40 : vector<8x128xi32> to vector<8x128xf32>
    %42 = arith.addf %23, %41 : vector<8x128xf32>
    %43 = arith.extui %34 : vector<8x128xi1> to vector<8x128xi32>
    %44 = arith.sitofp %43 : vector<8x128xi32> to vector<8x128xf32>
    %45 = arith.addf %26, %44 : vector<8x128xf32>
    %46 = arith.extui %36 : vector<8x128xi1> to vector<8x128xi32>
    %47 = arith.sitofp %46 : vector<8x128xi32> to vector<8x128xf32>
    %48 = arith.addf %29, %47 : vector<8x128xf32>
    %c0_19 = arith.constant 0 : index
    %c256 = arith.constant 256 : index
    %49 = vector.load %arg2[%c0_19, %c256] : memref<8x512xf32, #tpu.memory_space<vmem>>, vector<8x128xf32>
    %c0_20 = arith.constant 0 : index
    %c256_21 = arith.constant 256 : index
    %50 = vector.load %arg3[%c0_20, %c256_21] : memref<8x512xf32, #tpu.memory_space<vmem>>, vector<8x128xf32>
    %51 = arith.subf %49, %50 : vector<8x128xf32>
    %cst_22 = arith.constant 5.000000e-01 : f32
    %52 = vector.broadcast %cst_22 : f32 to vector<8x128xf32>
    %53 = arith.cmpf olt, %49, %52 : vector<8x128xf32>
    %cst_23 = arith.constant 5.000000e-01 : f32
    %54 = vector.broadcast %cst_23 : f32 to vector<8x128xf32>
    %55 = arith.cmpf olt, %50, %54 : vector<8x128xf32>
    %56 = arith.mulf %51, %51 : vector<8x128xf32>
    %57 = arith.addf %38, %56 : vector<8x128xf32>
    %58 = arith.andi %53, %55 : vector<8x128xi1>
    %59 = arith.extui %58 : vector<8x128xi1> to vector<8x128xi32>
    %60 = arith.sitofp %59 : vector<8x128xi32> to vector<8x128xf32>
    %61 = arith.addf %42, %60 : vector<8x128xf32>
    %62 = arith.extui %53 : vector<8x128xi1> to vector<8x128xi32>
    %63 = arith.sitofp %62 : vector<8x128xi32> to vector<8x128xf32>
    %64 = arith.addf %45, %63 : vector<8x128xf32>
    %65 = arith.extui %55 : vector<8x128xi1> to vector<8x128xi32>
    %66 = arith.sitofp %65 : vector<8x128xi32> to vector<8x128xf32>
    %67 = arith.addf %48, %66 : vector<8x128xf32>
    %c0_24 = arith.constant 0 : index
    %c384 = arith.constant 384 : index
    %68 = vector.load %arg2[%c0_24, %c384] : memref<8x512xf32, #tpu.memory_space<vmem>>, vector<8x128xf32>
    %c0_25 = arith.constant 0 : index
    %c384_26 = arith.constant 384 : index
    %69 = vector.load %arg3[%c0_25, %c384_26] : memref<8x512xf32, #tpu.memory_space<vmem>>, vector<8x128xf32>
    %70 = arith.subf %68, %69 : vector<8x128xf32>
    %cst_27 = arith.constant 5.000000e-01 : f32
    %71 = vector.broadcast %cst_27 : f32 to vector<8x128xf32>
    %72 = arith.cmpf olt, %68, %71 : vector<8x128xf32>
    %cst_28 = arith.constant 5.000000e-01 : f32
    %73 = vector.broadcast %cst_28 : f32 to vector<8x128xf32>
    %74 = arith.cmpf olt, %69, %73 : vector<8x128xf32>
    %75 = arith.mulf %70, %70 : vector<8x128xf32>
    %76 = arith.addf %57, %75 : vector<8x128xf32>
    %77 = arith.andi %72, %74 : vector<8x128xi1>
    %78 = arith.extui %77 : vector<8x128xi1> to vector<8x128xi32>
    %79 = arith.sitofp %78 : vector<8x128xi32> to vector<8x128xf32>
    %80 = arith.addf %61, %79 : vector<8x128xf32>
    %81 = arith.extui %72 : vector<8x128xi1> to vector<8x128xi32>
    %82 = arith.sitofp %81 : vector<8x128xi32> to vector<8x128xf32>
    %83 = arith.addf %64, %82 : vector<8x128xf32>
    %84 = arith.extui %74 : vector<8x128xi1> to vector<8x128xi32>
    %85 = arith.sitofp %84 : vector<8x128xi32> to vector<8x128xf32>
    %86 = arith.addf %67, %85 : vector<8x128xf32>
    %c0_29 = arith.constant 0 : index
    %c0_30 = arith.constant 0 : index
    %c0_31 = arith.constant 0 : index
    %87 = vector.load %arg4[%c0_29, %c0_30, %c0_31] : memref<4x8x128xf32, #tpu.memory_space<vmem>>, vector<1x8x128xf32>
    %88 = vector.shape_cast %87 : vector<1x8x128xf32> to vector<8x128xf32>
    %89 = vector.shape_cast %76 : vector<8x128xf32> to vector<1x8x128xf32>
    tpu.vector_store %arg4[%c0_29, %c0_30, %c0_31], %89 {strides = array<i32>} : memref<4x8x128xf32, #tpu.memory_space<vmem>>, vector<1x8x128xf32>,
    %c1_32 = arith.constant 1 : index
    %c0_33 = arith.constant 0 : index
    %c0_34 = arith.constant 0 : index
    %90 = vector.load %arg4[%c1_32, %c0_33, %c0_34] : memref<4x8x128xf32, #tpu.memory_space<vmem>>, vector<1x8x128xf32>
    %91 = vector.shape_cast %90 : vector<1x8x128xf32> to vector<8x128xf32>
    %92 = vector.shape_cast %80 : vector<8x128xf32> to vector<1x8x128xf32>
    tpu.vector_store %arg4[%c1_32, %c0_33, %c0_34], %92 {strides = array<i32>} : memref<4x8x128xf32, #tpu.memory_space<vmem>>, vector<1x8x128xf32>,
    %c2_35 = arith.constant 2 : index
    %c0_36 = arith.constant 0 : index
    %c0_37 = arith.constant 0 : index
    %93 = vector.load %arg4[%c2_35, %c0_36, %c0_37] : memref<4x8x128xf32, #tpu.memory_space<vmem>>, vector<1x8x128xf32>
    %94 = vector.shape_cast %93 : vector<1x8x128xf32> to vector<8x128xf32>
    %95 = vector.shape_cast %83 : vector<8x128xf32> to vector<1x8x128xf32>
    tpu.vector_store %arg4[%c2_35, %c0_36, %c0_37], %95 {strides = array<i32>} : memref<4x8x128xf32, #tpu.memory_space<vmem>>, vector<1x8x128xf32>,
    %c3_38 = arith.constant 3 : index
    %c0_39 = arith.constant 0 : index
    %c0_40 = arith.constant 0 : index
    %96 = vector.load %arg4[%c3_38, %c0_39, %c0_40] : memref<4x8x128xf32, #tpu.memory_space<vmem>>, vector<1x8x128xf32>
    %97 = vector.shape_cast %96 : vector<1x8x128xf32> to vector<8x128xf32>
    %98 = vector.shape_cast %86 : vector<8x128xf32> to vector<1x8x128xf32>
    tpu.vector_store %arg4[%c3_38, %c0_39, %c0_40], %98 {strides = array<i32>} : memref<4x8x128xf32, #tpu.memory_space<vmem>>, vector<1x8x128xf32>,
    return
  }
  func.func @transform_0(%arg0: i32, %arg1: i32) -> (i32, i32) {
    %c0_i32 = arith.constant 0 : i32
    return %arg0, %arg1 : i32, i32
  }
  func.func @transform_1(%arg0: i32, %arg1: i32) -> (i32, i32) {
    %c0_i32 = arith.constant 0 : i32
    return %arg0, %arg1 : i32, i32
  }
  func.func @transform_2(%arg0: i32, %arg1: i32) -> (i32, i32, i32) {
    %c0_i32 = arith.constant 0 : i32
    %c0_i32_0 = arith.constant 0 : i32
    %c0_i32_1 = arith.constant 0 : i32
    return %c0_i32, %arg0, %c0_i32_0 : i32, i32, i32
  }
}

</mosaic_0001>

<bundles_post_ra>
// kernel: tpu_custom_call.1
= control target key start
LH: loop header
LB: loop body
LE: loop exit
PB: predicated region body
PF: predicated region fallthrough
CT: control target
= control target key end

     0   :  { %7 = vsyncpa [#allocation3], 0  ;;  %s304_s0 = inlined_call_operand.hbm [shape: f32[8,512], index: 0, kind: input, shape index: {}]   ;;  %s305_s1 = inlined_call_operand.hbm [shape: f32[8,512], index: 1, kind: input, shape index: {}]   ;;  %s306_s2 = inlined_call_operand.hbm [shape: f32[4,8,128], index: 2, kind: output, shape index: {}]  }
   0x1   :  { %8 = vsyncpa [#allocation6], 0 }
   0x2   :  { %9 = vsyncpa [#allocation4], 0  ;;  %s231_s9 = smov [#allocation2]   ;;  %s232_s11 = smov [#allocation5]  }
   0x3   :  { %s16_s10 = sshll.u32 %s231_s9, 4  ;;  %s26_s12 = sshll.u32 %s232_s11, 4  ;;  %s17_s10 = int_to_ptr.vmem [resolvable:$true] %s16_s10  ;;  %s27_s12 = int_to_ptr.vmem [resolvable:$true] %s26_s12 }
   0x4   :  { %s159_s15 = scalar_lea.hbm %s304_s0, 512 }
   0x5   :  { %p160_p0 = scmp.ne.s32.totalorder %s304_s0, %s159_s15  ;;  %p163_p1 = scmp.lt.u32.totalorder %s159_s15, %s304_s0 }
   0x7   :  { %p165_p2 = pnand %p163_p1, %p160_p0 }
   0x9   :  { %168 = shalt.err (!%p165_p2)
}
   0xa   :  { %s169_s20 = scalar_lea.vmem %s17_s10, 512  ;;  %p174_p4 = scmp.lt.s32.totalorder %s17_s10, %s17_s10 }
   0xb   :  { %p170_p3 = scmp.ne.s32.totalorder %s17_s10, %s169_s20  ;;  %p175_p5 = scmp.lt.s32.totalorder %s169_s20, %s169_s20 }
   0xd   :  { %p176_p6 = por %p175_p5, %p174_p4 }
   0xf   :  { %p177_p7 = pnand %p176_p6, %p170_p3 }
  0x11   :  { %180 = shalt.err (!%p177_p7)
}
  0x12   :  { %19 = dma.hbm_to_vmem [thread:$0]  %s304_s0, 512, %s17_s10, [#allocation3]  }
  0x13   :  { %s181_s25 = scalar_lea.hbm %s305_s1, 512 }
  0x14   :  { %p182_p8 = scmp.ne.s32.totalorder %s305_s1, %s181_s25  ;;  %p185_p9 = scmp.lt.u32.totalorder %s181_s25, %s305_s1 }
  0x16   :  { %p187_p10 = pnand %p185_p9, %p182_p8 }
  0x18   :  { %190 = shalt.err (!%p187_p10)
}
  0x19   :  { %s191_s30 = scalar_lea.vmem %s27_s12, 512  ;;  %p196_p12 = scmp.lt.s32.totalorder %s27_s12, %s27_s12 }
  0x1a   :  { %p192_p11 = scmp.ne.s32.totalorder %s27_s12, %s191_s30  ;;  %p197_p13 = scmp.lt.s32.totalorder %s191_s30, %s191_s30 }
  0x1c   :  { %p198_p0 = por %p197_p13, %p196_p12 }
  0x1e   :  { %p199_p1 = pnand %p198_p0, %p192_p11 }
  0x20   :  { %202 = shalt.err (!%p199_p1)
}
  0x21   :  { %29 = dma.hbm_to_vmem [thread:$0]  %s305_s1, 512, %s27_s12, [#allocation6]  }
  0x22   :  { %225 = dma.done.wait [#allocation3], 512  }
  0x23   :  { %226 = vsyncadd [#allocation3], 4294966784 }
  0x24   :  { %227 = dma.done.wait [#allocation6], 512  }
  0x25   :  { %228 = vsyncadd [#allocation6], 4294966784  ;;  %v51_v0 = vld [vmem:[#allocation2] sm:$0xff]  ;;  %v68_v2 = vld [vmem:[#allocation2 + $0x8] sm:$0xff]  ;;  %v233_v13 = vmov 0.0   ;;  %s234_s1 = smov [#allocation7]  }
  0x26   :  { %v52_v1 = vld [vmem:[#allocation5] sm:$0xff]  ;;  %v69_v4 = vld [vmem:[#allocation5 + $0x8] sm:$0xff]  ;;  %v85_v5 = vld [vmem:[#allocation2 + $0x10] sm:$0xff]  ;;  %vm54_vm0 = vcmp.lt.f32.partialorder %v51_v0, 0.5  ;;  %vm71_vm2 = vcmp.lt.f32.partialorder %v68_v2, 0.5  ;;  %s128_s4 = sshll.u32 %s234_s1, 4  ;;  %s129_s4 = int_to_ptr.vmem [resolvable:$true] %s128_s4 }
  0x27   :  { %v53_v3 = vsub.f32 %v51_v0, %v52_v1  ;;  %v86_v6 = vld [vmem:[#allocation5 + $0x10] sm:$0xff]  ;;  %vm55_vm1 = vcmp.lt.f32.partialorder %v52_v1, 0.5  ;;  %v70_v7 = vsub.f32 %v68_v2, %v69_v4  ;;  %v102_v9 = vld [vmem:[#allocation2 + $0x18] sm:$0xff]  ;;  %vm72_vm4 = vcmp.lt.f32.partialorder %v69_v4, 0.5  ;;  %s203_s5 = scalar_lea.vmem %s129_s4, 512  ;;  %p208_p3 = scmp.lt.s32.totalorder %s129_s4, %s129_s4 }
  0x28   :  { %v87_v8 = vsub.f32 %v85_v5, %v86_v6  ;;  %v103_v10 = vld [vmem:[#allocation5 + $0x18] sm:$0xff]  ;;  %vm58_vm3 = vmand %vm54_vm0, %vm55_vm1  ;;  %vm88_vm5 = vcmp.lt.f32.partialorder %v85_v5, 0.5  ;;  %vm89_vm7 = vcmp.lt.f32.partialorder %v86_v6, 0.5  ;;  %vm105_vm9 = vcmp.lt.f32.partialorder %v102_v9, 0.5  ;;  %p204_p2 = scmp.ne.s32.totalorder %s129_s4, %s203_s5  ;;  %p209_p4 = scmp.lt.s32.totalorder %s203_s5, %s203_s5 }
  0x29   :  { %v56_v11 = vmul.f32 %v53_v3, %v53_v3  ;;  %v104_v12 = vsub.f32 %v102_v9, %v103_v10  ;;  %v141_v14 = vsel %vm58_vm3, 1.0, %v233_v13  ;;  %vm75_vm6 = vmand %vm71_vm2, %vm72_vm4  ;;  %v73_v15 = vmul.f32 %v70_v7, %v70_v7 }
  0x2a   :  { %v144_v16 = vsel %vm75_vm6, 1.0, %v233_v13  ;;  %vm92_vm8 = vmand %vm88_vm5, %vm89_vm7  ;;  %v90_v17 = vmul.f32 %v87_v8, %v87_v8  ;;  %vm106_vm10 = vcmp.lt.f32.partialorder %v103_v10, 0.5  ;;  %v142_v20 = vsel %vm54_vm0, 1.0, %v233_v13  ;;  %p210_p5 = por %p209_p4, %p208_p3 }
  0x2b   :  { %v147_v18 = vsel %vm92_vm8, 1.0, %v233_v13  ;;  %v78_v19 = vadd.f32 %v144_v16, %v141_v14  ;;  %v145_v21 = vsel %vm71_vm2, 1.0, %v233_v13  ;;  %v74_v22 = vadd.f32 %v73_v15, %v56_v11  ;;  %vm109_vm11 = vmand %vm105_vm9, %vm106_vm10 }
  0x2c   :  { %v107_v23 = vmul.f32 %v104_v12, %v104_v12  ;;  %v148_v24 = vsel %vm88_vm5, 1.0, %v233_v13  ;;  %v150_v26 = vsel %vm109_vm11, 1.0, %v233_v13  ;;  %v143_v27 = vsel %vm55_vm1, 1.0, %v233_v13  ;;  %p211_p6 = pnand %p210_p5, %p204_p2 }
  0x2d   :  { %v95_v25 = vadd.f32 %v147_v18, %v78_v19  ;;  %v146_v28 = vsel %vm72_vm4, 1.0, %v233_v13  ;;  %v91_v29 = vadd.f32 %v90_v17, %v74_v22  ;;  %v81_v30 = vadd.f32 %v145_v21, %v142_v20 }
  0x2e   :  { %v151_v32 = vsel %vm105_vm9, 1.0, %v233_v13  ;;  %v149_v33 = vsel %vm89_vm7, 1.0, %v233_v13  ;;  %v84_v36 = vadd.f32 %v146_v28, %v143_v27  ;;  %v152_v37 = vsel %vm106_vm10, 1.0, %v233_v13 }
  0x2f   :  { %v112_v31 = vadd.f32 %v150_v26, %v95_v25  ;;  %v108_v34 = vadd.f32 %v107_v23, %v91_v29  ;;  %v98_v35 = vadd.f32 %v148_v24, %v81_v30 }
  0x30   :  { %v101_v39 = vadd.f32 %v149_v33, %v84_v36 }
  0x31   :  { %120 = vst [vmem:[#allocation7 + $0x8] sm:$0xff] %v112_v31  ;;  %119 = vst [vmem:[#allocation7] sm:$0xff] %v108_v34  ;;  %v115_v38 = vadd.f32 %v151_v32, %v98_v35 }
  0x32   :  { %v118_v40 = vadd.f32 %v152_v37, %v101_v39 }
  0x33   :  { %121 = vst [vmem:[#allocation7 + $0x10] sm:$0xff] %v115_v38 }
  0x34   :  { %122 = vst [vmem:[#allocation7 + $0x18] sm:$0xff] %v118_v40 }
  0x35   :  { %214 = shalt.err (!%p211_p6)
}
  0x36   :  { %s215_s8 = scalar_lea.hbm %s306_s2, 512 }
  0x37   :  { %p216_p7 = scmp.ne.s32.totalorder %s306_s2, %s215_s8  ;;  %p219_p8 = scmp.lt.u32.totalorder %s215_s8, %s306_s2 }
  0x39   :  { %p221_p9 = pnand %p219_p8, %p216_p7 }
  0x3b   :  { %224 = shalt.err (!%p221_p9)
}
  0x3c   :  { %s235_s13 = smov 128   ;;  %s236_s14 = smov 8  }
  0x3d   :  { %134 = dma.vmem_to_hbm [thread:$0]  %s129_s4, 512, %s306_s2, [#allocation4], %s235_s13, %s235_s13, %s236_s14  }
  0x3e   :  { %229 = dma.done.wait [#allocation4], 512  }
  0x3f   :  { %230 = vsyncadd [#allocation4], 4294966784 }
  0x40   :  { %138 = vsyncpa [#allocation3], 1 }
  0x41   :  { %139 = vsyncpa [#allocation6], 1 }
  0x42   :  { %140 = vsyncpa [#allocation4], 1 }

</bundles_post_ra>
